<compile_context>
chip_gen: v6e
topology: v6e:2x2x1
jax: 0.10.0
libtpu: 0.0.40
codegen_flags: <defaults>
</compile_context>

<pallas_src>
import functools

import jax
import jax.numpy as jnp
from jax import lax
from jax.experimental import pallas as pl
from jax.experimental.pallas import tpu as pltpu


def _round_up(x, m):
    return ((x + m - 1) // m) * m


def _vmem_capacity_bytes():
    """Physical VMEM of this generation (conservative fallback: v7x's 64 MiB)."""
    try:
        return int(pltpu.get_tpu_info().vmem_capacity_bytes)
    except Exception:
        return 64 * 1024 * 1024


def _fc_epilogue(pooled, w_ref, b_ref, o_ref):
    """pooled (tb, D_pad) -> sigmoid(pooled @ W + b); lane-dense (C_pad=128k) store."""
    logits = jnp.dot(pooled.astype(jnp.float32), w_ref[...],
                     preferred_element_type=jnp.float32) + b_ref[...]
    o_ref[...] = jax.nn.sigmoid(logits).astype(o_ref.dtype)


# ---------------------------------------------------------------------------
# Primary path: embedding table resident in VMEM, in-kernel dynamic row gather.
# ---------------------------------------------------------------------------
def _fasttext_vmem_kernel(ids_ref, emb_ref, w_ref, b_ref, o_ref, acc,
                          *, block_b, seq_len):
    """One grid step = one batch tile of `block_b` rows.

    ids_ref : SMEM (B_pad * L,) int32     scalar-prefetched token ids (flattened)
    emb_ref : VMEM (V_pad, D_pad)         whole embedding table (constant block,
                                          read from HBM once, reused every step)
    w_ref   : VMEM (D_pad, C_pad) f32     fc weight, pre-transposed, zero-padded
    b_ref   : VMEM (1, C_pad) f32         fc bias, zero-padded
    o_ref   : VMEM (block_b, C_pad) f32   sigmoid(logits) for this tile
    acc     : VMEM (block_b, D_pad)       max-pooled embeddings for this tile
    """
    i = pl.program_id(0)
    tb, L = block_b, seq_len
    base = i * tb * L
    inner_unroll = True if L <= 32 else 8   # give LLO full visibility of short loops

    @pl.loop(0, tb)
    def _(b):
        off = base + b * L
        # Init the running max from token 0 (no -inf fill + extra max pass).
        m = emb_ref[pl.ds(ids_ref[off], 1), :].astype(acc.dtype)

        def tok(l, m):
            row = emb_ref[pl.ds(ids_ref[off + l], 1), :].astype(acc.dtype)
            return jnp.maximum(m, row)

        m = lax.fori_loop(1, L, tok, m, unroll=inner_unroll)
        acc[pl.ds(b, 1), :] = m

    _fc_epilogue(acc[...], w_ref, b_ref, o_ref)


# ---------------------------------------------------------------------------
# Fallback path: table stays in HBM, manually pipelined per-row DMA gather.
# ---------------------------------------------------------------------------
def _fasttext_hbm_kernel(ids_ref, emb_hbm, w_ref, b_ref, o_ref,
                         buf, sem, acc, *, block_b, seq_len, n_slots):
    """ids_ref SMEM; emb_hbm ANY(HBM); buf VMEM (n_slots, tb, D_pad);
    sem DMA (n_slots,) shared per slot; acc VMEM (tb, D_pad)."""
    i = pl.program_id(0)
    tb, L = block_b, seq_len
    base = i * tb * L

    def start_fetch(l, slot):
        # One row DMA per batch element of this tile; all share the slot sem.
        @pl.loop(0, tb)
        def _(b):
            row = ids_ref[base + b * L + l]
            pltpu.make_async_copy(emb_hbm.at[row], buf.at[slot, b],
                                  sem.at[slot]).start()

    def wait_slot(slot):
        # Per-row-sized waits on the single shared slot semaphore.
        @pl.loop(0, tb)
        def _(b):
            pltpu.make_async_copy(buf.at[slot, b], buf.at[slot, b],
                                  sem.at[slot]).wait()

    # Prime the pipeline: up to n_slots tokens in flight before the first wait.
    for l0 in range(min(L, n_slots)):
        start_fetch(l0, l0)

    @pl.loop(0, L)
    def _(l):
        slot = l % n_slots
        wait_slot(slot)
        rows = buf[slot].astype(acc.dtype)               # (tb, D_pad)

        @pl.when(l == 0)
        def _():
            acc[...] = rows                              # init from first token

        @pl.when(l > 0)
        def _():
            acc[...] = jnp.maximum(acc[...], rows)

        # Refill the just-consumed slot with token l + n_slots (stays in flight
        # for the next n_slots - 1 tokens -> latency hidden).
        @pl.when(l + n_slots < L)
        def _():
            start_fetch(l + n_slots, slot)

    _fc_epilogue(acc[...], w_ref, b_ref, o_ref)


# ---------------------------------------------------------------------------
# Wrapper
# ---------------------------------------------------------------------------
def fasttext_forward(token_ids, emb_table, fc_weight, fc_bias, *,
                     block_b=128, stream_dtype=jnp.bfloat16,
                     resident_dtype=jnp.float32,
                     table_in_vmem=None, prefetch_slots=4):
    """token_ids (B, L) int; emb_table (V, D) f32; fc_weight (C, D); fc_bias (C,).

    table_in_vmem: None = auto (fit the padded table within a generation-specific
      VMEM budget), True/False to force the resident / HBM-streaming path.
    stream_dtype: dtype rows are DMA'd & max-pooled in on the HBM path
      (bf16 default; pass float32 on v5e or for bit-exact parity).
    """
    B, L = token_ids.shape
    V, D = emb_table.shape
    C = fc_weight.shape[0]

    d_pad = _round_up(D, 128)           # lane-dense embedding rows
    c_pad = _round_up(C, 128)           # lane-dense logits / weight-N
    v_pad = _round_up(V, 16)

    # Batch tile: multiple of 8, aim for >= 2 grid steps for multi-TensorCore parts.
    tb = min(block_b, max(8, _round_up(pl.cdiv(B, 2), 8)))
    tb = max(8, (tb // 8) * 8)
    batch_pad = _round_up(B, tb)
    n_tiles = batch_pad // tb

    ids = jnp.pad(token_ids.astype(jnp.int32),
                  ((0, batch_pad - B), (0, 0))).reshape(-1)

    w_p = jnp.zeros((d_pad, c_pad), jnp.float32).at[:D, :C].set(
        fc_weight.T.astype(jnp.float32))
    b_p = jnp.zeros((1, c_pad), jnp.float32).at[:, :C].set(
        fc_bias.astype(jnp.float32))

    # Generation-specific VMEM budget (v7x 64 MiB vs v5e/v6e 128 MiB physical).
    cap = _vmem_capacity_bytes()
    res_isz = jnp.dtype(resident_dtype).itemsize
    str_isz = jnp.dtype(stream_dtype).itemsize
    fixed_bytes = (2 * (w_p.size * 4 + b_p.size * 4 + tb * c_pad * 4)   # dbl-buffered w/b/out
                   + tb * d_pad * 4)                                    # acc scratch
    resident_need = 2 * (v_pad * d_pad * res_isz) + fixed_bytes + (4 << 20)
    if table_in_vmem is None:
        table_in_vmem = resident_need <= int(0.85 * cap)

    table_dtype = resident_dtype if table_in_vmem else stream_dtype
    emb_p = jnp.zeros((v_pad, d_pad), table_dtype).at[:V, :D].set(
        emb_table.astype(table_dtype))

    common_specs = [
        pl.BlockSpec((d_pad, c_pad), lambda i, _ids: (0, 0)),   # fc weight (resident)
        pl.BlockSpec((1, c_pad), lambda i, _ids: (0, 0)),       # fc bias  (resident)
    ]
    out_spec = pl.BlockSpec((tb, c_pad), lambda i, _ids: (i, 0))

    if table_in_vmem:
        kernel = functools.partial(_fasttext_vmem_kernel, block_b=tb, seq_len=L)
        grid_spec = pltpu.PrefetchScalarGridSpec(
            num_scalar_prefetch=1,                              # token ids -> SMEM
            grid=(n_tiles,),
            in_specs=[pl.BlockSpec((v_pad, d_pad), lambda i, _ids: (0, 0))]
                     + common_specs,
            out_specs=out_spec,
            scratch_shapes=[pltpu.VMEM((tb, d_pad), table_dtype)],
        )
        vmem_limit = resident_need
    else:
        kernel = functools.partial(_fasttext_hbm_kernel, block_b=tb, seq_len=L,
                                   n_slots=prefetch_slots)
        grid_spec = pltpu.PrefetchScalarGridSpec(
            num_scalar_prefetch=1,
            grid=(n_tiles,),
            in_specs=[pl.BlockSpec(memory_space=pl.ANY)] + common_specs,
            out_specs=out_spec,
            scratch_shapes=[
                pltpu.VMEM((prefetch_slots, tb, d_pad), stream_dtype),  # gather buffers
                pltpu.SemaphoreType.DMA((prefetch_slots,)),             # one sem per slot
                pltpu.VMEM((tb, d_pad), stream_dtype),                  # running max
            ],
        )
        vmem_limit = fixed_bytes + prefetch_slots * tb * d_pad * str_isz + (8 << 20)

    vmem_limit = int(max(32 * 1024 * 1024, min(vmem_limit, int(0.9 * cap))))

    out = pl.pallas_call(
        kernel,
        out_shape=jax.ShapeDtypeStruct((batch_pad, c_pad), jnp.float32),
        grid_spec=grid_spec,
        compiler_params=pltpu.CompilerParams(
            dimension_semantics=("parallel",),      # batch tiles -> multi-core split
            vmem_limit_bytes=vmem_limit,
        ),
    )(ids, emb_p, w_p, b_p)

    return out[:B, :C]


if __name__ == "__main__":
    # Small deterministic shapes consistent with the module.
    VOCAB = 50
    N_CLASS = 5
    EMBED_DIM = 32
    B, L = 2, 8

    key = jax.random.PRNGKey(0)
    k_emb, k_w, k_b, k_x = jax.random.split(key, 4)

    emb_table = jax.random.normal(k_emb, (VOCAB, EMBED_DIM), dtype=jnp.float32)
    bound = 1.0 / (EMBED_DIM ** 0.5)
    fc_weight = jax.random.uniform(k_w, (N_CLASS, EMBED_DIM),
                                   minval=-bound, maxval=bound, dtype=jnp.float32)
    fc_bias = jax.random.uniform(k_b, (N_CLASS,),
                                 minval=-bound, maxval=bound, dtype=jnp.float32)
    token_ids = jax.random.randint(k_x, (B, L), 0, VOCAB, dtype=jnp.int32)

    # References.
    pooled_f32 = jnp.max(jnp.take(emb_table, token_ids, axis=0), axis=1)
    ref_f32 = jax.nn.sigmoid(pooled_f32 @ fc_weight.T + fc_bias)
    emb_bf16 = emb_table.astype(jnp.bfloat16).astype(jnp.float32)
    pooled_bf16 = jnp.max(jnp.take(emb_bf16, token_ids, axis=0), axis=1)
    ref_bf16 = jax.nn.sigmoid(pooled_bf16 @ fc_weight.T + fc_bias)

    # 1) Primary path: VMEM-resident (f32) table -> exact module numerics.
    out = jax.block_until_ready(
        fasttext_forward(token_ids, emb_table, fc_weight, fc_bias))
    assert out.shape == (B, N_CLASS)
    assert jnp.allclose(out, ref_f32, atol=1e-4, rtol=1e-4), \
        f"vmem path max abs err {jnp.max(jnp.abs(out - ref_f32))}"

    # 2) Fallback path (forced): HBM row-DMA gather, bf16 streaming.
    out_hbm = jax.block_until_ready(
        fasttext_forward(token_ids, emb_table, fc_weight, fc_bias,
                         table_in_vmem=False))
    assert jnp.allclose(out_hbm, ref_bf16, atol=1e-4, rtol=1e-4), \
        f"hbm path max abs err {jnp.max(jnp.abs(out_hbm - ref_bf16))}"
    assert jnp.allclose(out_hbm, ref_f32, atol=5e-2, rtol=5e-2)

    # 3) Fallback path with f32 streaming (v5e-style / bit-exact config).
    out_hbm32 = jax.block_until_ready(
        fasttext_forward(token_ids, emb_table, fc_weight, fc_bias,
                         table_in_vmem=False, stream_dtype=jnp.float32))
    assert jnp.allclose(out_hbm32, ref_f32, atol=1e-4, rtol=1e-4), \
        f"hbm f32 path max abs err {jnp.max(jnp.abs(out_hbm32 - ref_f32))}"

    print("KERNEL_OK")
</pallas_src>

<mosaic_0001>
module attributes {stable_mosaic.version = 11 : i64} {
  func.func @_fasttext_vmem_kernel(%arg0: i32, %arg1: memref<64xi32, #tpu.memory_space<smem>>, %arg2: memref<64x128xf32, #tpu.memory_space<vmem>>, %arg3: memref<128x128xf32, #tpu.memory_space<vmem>>, %arg4: memref<1x128xf32, #tpu.memory_space<vmem>>, %arg5: memref<8x128xf32, #tpu.memory_space<vmem>>, %arg6: memref<8x128xf32, #tpu.memory_space<vmem>>) attributes {dimension_semantics = [#tpu.dimension_semantics<parallel>], iteration_bounds = array<i64: 1>, scalar_prefetch = 1 : i64, scratch_operands = 1 : i64, tpu.core_type = #tpu.core_type<tc>, window_params = [{pipeline_mode = #tpu.pipeline_mode<synchronous>, transform_indices = @transform_0, window_bounds = array<i64: 64, 128>}, {pipeline_mode = #tpu.pipeline_mode<synchronous>, transform_indices = @transform_1, window_bounds = array<i64: 128, 128>}, {pipeline_mode = #tpu.pipeline_mode<synchronous>, transform_indices = @transform_2, window_bounds = array<i64: 1, 128>}, {transform_indices = @transform_3, window_bounds = array<i64: 8, 128>}]} {
    %c8_i32 = arith.constant 8 : i32
    %0 = arith.muli %arg0, %c8_i32 : i32
    %c8_i32_0 = arith.constant 8 : i32
    %1 = arith.muli %0, %c8_i32_0 : i32
    %c0_i32 = arith.constant 0 : i32
    %c8_i32_1 = arith.constant 8 : i32
    %2 = arith.addi %c0_i32, %c8_i32_1 : i32
    %c1_i32 = arith.constant 1 : i32
    scf.for %arg7 = %c0_i32 to %2 step %c1_i32  : i32 {
      %c1_i32_11 = arith.constant 1 : i32
      %15 = arith.muli %arg7, %c1_i32_11 : i32
      %c0_i32_12 = arith.constant 0 : i32
      %16 = arith.addi %c0_i32_12, %15 : i32
      %c8_i32_13 = arith.constant 8 : i32
      %17 = arith.muli %16, %c8_i32_13 : i32
      %18 = arith.addi %1, %17 : i32
      %19 = arith.index_cast %18 : i32 to index
      %20 = memref.load %arg1[%19] : memref<64xi32, #tpu.memory_space<smem>>
      %21 = arith.index_cast %20 : i32 to index
      %c0_14 = arith.constant 0 : index
      %22 = vector.load %arg2[%21, %c0_14] : memref<64x128xf32, #tpu.memory_space<vmem>>, vector<1x128xf32>
      %c1_i32_15 = arith.constant 1 : i32
      %23 = arith.addi %18, %c1_i32_15 : i32
      %24 = arith.index_cast %23 : i32 to index
      %25 = memref.load %arg1[%24] : memref<64xi32, #tpu.memory_space<smem>>
      %26 = arith.index_cast %25 : i32 to index
      %c0_16 = arith.constant 0 : index
      %27 = vector.load %arg2[%26, %c0_16] : memref<64x128xf32, #tpu.memory_space<vmem>>, vector<1x128xf32>
      %28 = arith.maximumf %22, %27 : vector<1x128xf32>
      %c2_i32 = arith.constant 2 : i32
      %29 = arith.addi %18, %c2_i32 : i32
      %30 = arith.index_cast %29 : i32 to index
      %31 = memref.load %arg1[%30] : memref<64xi32, #tpu.memory_space<smem>>
      %32 = arith.index_cast %31 : i32 to index
      %c0_17 = arith.constant 0 : index
      %33 = vector.load %arg2[%32, %c0_17] : memref<64x128xf32, #tpu.memory_space<vmem>>, vector<1x128xf32>
      %34 = arith.maximumf %28, %33 : vector<1x128xf32>
      %c3_i32 = arith.constant 3 : i32
      %35 = arith.addi %18, %c3_i32 : i32
      %36 = arith.index_cast %35 : i32 to index
      %37 = memref.load %arg1[%36] : memref<64xi32, #tpu.memory_space<smem>>
      %38 = arith.index_cast %37 : i32 to index
      %c0_18 = arith.constant 0 : index
      %39 = vector.load %arg2[%38, %c0_18] : memref<64x128xf32, #tpu.memory_space<vmem>>, vector<1x128xf32>
      %40 = arith.maximumf %34, %39 : vector<1x128xf32>
      %c4_i32 = arith.constant 4 : i32
      %41 = arith.addi %18, %c4_i32 : i32
      %42 = arith.index_cast %41 : i32 to index
      %43 = memref.load %arg1[%42] : memref<64xi32, #tpu.memory_space<smem>>
      %44 = arith.index_cast %43 : i32 to index
      %c0_19 = arith.constant 0 : index
      %45 = vector.load %arg2[%44, %c0_19] : memref<64x128xf32, #tpu.memory_space<vmem>>, vector<1x128xf32>
      %46 = arith.maximumf %40, %45 : vector<1x128xf32>
      %c5_i32 = arith.constant 5 : i32
      %47 = arith.addi %18, %c5_i32 : i32
      %48 = arith.index_cast %47 : i32 to index
      %49 = memref.load %arg1[%48] : memref<64xi32, #tpu.memory_space<smem>>
      %50 = arith.index_cast %49 : i32 to index
      %c0_20 = arith.constant 0 : index
      %51 = vector.load %arg2[%50, %c0_20] : memref<64x128xf32, #tpu.memory_space<vmem>>, vector<1x128xf32>
      %52 = arith.maximumf %46, %51 : vector<1x128xf32>
      %c6_i32 = arith.constant 6 : i32
      %53 = arith.addi %18, %c6_i32 : i32
      %54 = arith.index_cast %53 : i32 to index
      %55 = memref.load %arg1[%54] : memref<64xi32, #tpu.memory_space<smem>>
      %56 = arith.index_cast %55 : i32 to index
      %c0_21 = arith.constant 0 : index
      %57 = vector.load %arg2[%56, %c0_21] : memref<64x128xf32, #tpu.memory_space<vmem>>, vector<1x128xf32>
      %58 = arith.maximumf %52, %57 : vector<1x128xf32>
      %c7_i32 = arith.constant 7 : i32
      %59 = arith.addi %18, %c7_i32 : i32
      %60 = arith.index_cast %59 : i32 to index
      %61 = memref.load %arg1[%60] : memref<64xi32, #tpu.memory_space<smem>>
      %62 = arith.index_cast %61 : i32 to index
      %c0_22 = arith.constant 0 : index
      %63 = vector.load %arg2[%62, %c0_22] : memref<64x128xf32, #tpu.memory_space<vmem>>, vector<1x128xf32>
      %64 = arith.maximumf %58, %63 : vector<1x128xf32>
      %c7_i32_23 = arith.constant 7 : i32
      %65 = arith.index_cast %16 : i32 to index
      %c0_24 = arith.constant 0 : index
      %66 = vector.load %arg6[%65, %c0_24] : memref<8x128xf32, #tpu.memory_space<vmem>>, vector<1x128xf32>
      tpu.vector_store %arg6[%65, %c0_24], %64 {strides = array<i32>} : memref<8x128xf32, #tpu.memory_space<vmem>>, vector<1x128xf32>,
    }
    %c8_i32_2 = arith.constant 8 : i32
    %c0 = arith.constant 0 : index
    %c0_3 = arith.constant 0 : index
    %3 = vector.load %arg6[%c0, %c0_3] : memref<8x128xf32, #tpu.memory_space<vmem>>, vector<8x128xf32>
    %c0_4 = arith.constant 0 : index
    %c0_5 = arith.constant 0 : index
    %4 = vector.load %arg3[%c0_4, %c0_5] : memref<128x128xf32, #tpu.memory_space<vmem>>, vector<128x128xf32>
    %cst = arith.constant dense<0.000000e+00> : vector<8x128xf32>
    %5 = tpu.matmul %3, %4, %cst {dimension_numbers = #tpu.dot_dimension_numbers<[1], [0], [0], [1], [0, 0, 1, 1], [], []>} : vector<8x128xf32>, vector<128x128xf32>, vector<8x128xf32> -> vector<8x128xf32>
    %c0_6 = arith.constant 0 : index
    %c0_7 = arith.constant 0 : index
    %6 = vector.load %arg4[%c0_6, %c0_7] : memref<1x128xf32, #tpu.memory_space<vmem>>, vector<1x128xf32>
    %7 = vector.broadcast %6 : vector<1x128xf32> to vector<8x128xf32>
    %8 = arith.addf %5, %7 : vector<8x128xf32>
    %9 = arith.negf %8 : vector<8x128xf32>
    %10 = math.exp %9 : vector<8x128xf32>
    %cst_8 = arith.constant 1.000000e+00 : f32
    %11 = vector.broadcast %cst_8 : f32 to vector<8x128xf32>
    %12 = arith.addf %11, %10 : vector<8x128xf32>
    %13 = arith.divf %11, %12 : vector<8x128xf32>
    %c0_9 = arith.constant 0 : index
    %c0_10 = arith.constant 0 : index
    %14 = vector.load %arg5[%c0_9, %c0_10] : memref<8x128xf32, #tpu.memory_space<vmem>>, vector<8x128xf32>
    tpu.vector_store %arg5[%c0_9, %c0_10], %13 {strides = array<i32>} : memref<8x128xf32, #tpu.memory_space<vmem>>, vector<8x128xf32>,
    return
  }
  func.func @transform_0(%arg0: i32, %arg1: memref<64xi32, #tpu.memory_space<smem>>) -> (i32, i32) {
    %c0_i32 = arith.constant 0 : i32
    %c0_i32_0 = arith.constant 0 : i32
    %c0_i32_1 = arith.constant 0 : i32
    return %c0_i32, %c0_i32_0 : i32, i32
  }
  func.func @transform_1(%arg0: i32, %arg1: memref<64xi32, #tpu.memory_space<smem>>) -> (i32, i32) {
    %c0_i32 = arith.constant 0 : i32
    %c0_i32_0 = arith.constant 0 : i32
    %c0_i32_1 = arith.constant 0 : i32
    return %c0_i32, %c0_i32_0 : i32, i32
  }
  func.func @transform_2(%arg0: i32, %arg1: memref<64xi32, #tpu.memory_space<smem>>) -> (i32, i32) {
    %c0_i32 = arith.constant 0 : i32
    %c0_i32_0 = arith.constant 0 : i32
    %c0_i32_1 = arith.constant 0 : i32
    return %c0_i32, %c0_i32_0 : i32, i32
  }
  func.func @transform_3(%arg0: i32, %arg1: memref<64xi32, #tpu.memory_space<smem>>) -> (i32, i32) {
    %c0_i32 = arith.constant 0 : i32
    %c0_i32_0 = arith.constant 0 : i32
    return %arg0, %c0_i32 : i32, i32
  }
}

</mosaic_0001>

<bundles_post_ra>
// kernel: tpu_custom_call.1
= control target key start
LH: loop header
LB: loop body
LE: loop exit
PB: predicated region body
PF: predicated region fallthrough
CT: control target
= control target key end

     0   :  { %s387_s15 = smov [#allocation4]   ;;  %s445_s0 = inlined_call_operand.hbm [shape: s32[64], index: 0, kind: input, shape index: {}]   ;;  %s446_s1 = inlined_call_operand.hbm [shape: f32[64,128], index: 1, kind: input, shape index: {}]   ;;  %s447_s2 = inlined_call_operand.hbm [shape: f32[128,128], index: 2, kind: input, shape index: {}]   ;;  %s448_s3 = inlined_call_operand.vmem [shape: f32[1,128], index: 3, kind: input, shape index: {}]   ;;  %s449_s4 = inlined_call_operand.hbm [shape: f32[8,128], index: 4, kind: output, shape index: {}]  }
   0x1   :  { %10 = dma.hbm_to_smem %s445_s0, 16, %s387_s15, [#allocation3] }
   0x2   :  { %375 = dma.done.wait [#allocation3], 16 }
   0x3   :  { %376 = vsyncadd [#allocation3], 4294967280 }
   0x4   :  { %12 = sfence }
   0x5   :  { %13 = vsyncpa [#allocation6], 0 }
   0x6   :  { %14 = vsyncpa [#allocation9], 0 }
   0x7   :  { %15 = vsyncpa [#allocation7], 0  ;;  %s388_s18 = smov [#allocation5]  }
   0x8   :  { %s21_s19 = sshll.u32 %s388_s18, 4  ;;  %s22_s19 = int_to_ptr.vmem [resolvable:$true] %s21_s19 }
   0x9   :  { %s319_s20 = scalar_lea.vmem %s22_s19, 1024  ;;  %p324_p1 = scmp.lt.s32.totalorder %s22_s19, %s22_s19 }
   0xa   :  { %p320_p0 = scmp.ne.s32.totalorder %s22_s19, %s319_s20  ;;  %p325_p2 = scmp.lt.s32.totalorder %s319_s20, %s319_s20 }
   0xc   :  { %p326_p3 = por %p325_p2, %p324_p1 }
   0xe   :  { %p327_p4 = pnand %p326_p3, %p320_p0 }
  0x10   :  { %330 = shalt.err (!%p327_p4)
}
  0x11   :  { %s389_s21 = smov 128   ;;  %s390_s22 = smov 8  }
  0x12   :  { %27 = dma.hbm_to_vmem [thread:$0]  %s446_s1, 1024, %s22_s19, [#allocation6], %s389_s21, %s389_s21, %s390_s22  }
  0x13   :  { %s391_s24 = smov [#allocation8]  }
  0x14   :  { %s33_s25 = sshll.u32 %s391_s24, 4  ;;  %s34_s25 = int_to_ptr.vmem [resolvable:$true] %s33_s25 }
  0x15   :  { %s339_s26 = scalar_lea.vmem %s34_s25, 2048  ;;  %p344_p6 = scmp.lt.s32.totalorder %s34_s25, %s34_s25 }
  0x16   :  { %p340_p5 = scmp.ne.s32.totalorder %s34_s25, %s339_s26  ;;  %p345_p7 = scmp.lt.s32.totalorder %s339_s26, %s339_s26 }
  0x18   :  { %p346_p8 = por %p345_p7, %p344_p6 }
  0x1a   :  { %p347_p9 = pnand %p346_p8, %p340_p5 }
  0x1c   :  { %350 = shalt.err (!%p347_p9)
}
  0x1d   :  { %39 = dma.hbm_to_vmem [thread:$0]  %s447_s2, 2048, %s34_s25, [#allocation9], %s389_s21, %s389_s21, %s390_s22  }
  0x1e   :  { %377 = dma.done.wait [#allocation6], 1024  }
  0x1f   :  { %378 = vsyncadd [#allocation6], 4294966272 }
  0x20   :  { %379 = dma.done.wait [#allocation9], 2048  }
  0x21   :  { %380 = vsyncadd [#allocation9], 4294965248  ;;  %s429_s29 = smov 0  }
  0x22 LB: > { %s228_s1 = sshll.u32 %s385_s29, 3  ;;  %s95_s25 = scalar_lea.vmem [#allocation2], %s385_s29  ;;  %s385_s29 = sphi %s429_s29, %s54_s29  }
  0x23   : > { %s57_s30 = sld [smem:[#allocation4 + %s228_s1]]  ;;  %s60_s5 = sadd.s32 1, %s228_s1 }
  0x24   : > { %s61_s6 = sld [smem:[#allocation4 + %s60_s5]]  ;;  %s65_s7 = sadd.s32 2, %s228_s1 }
  0x25   : > { %s66_s8 = sld [smem:[#allocation4 + %s65_s7]]  ;;  %s70_s9 = sadd.s32 3, %s228_s1 }
  0x26   : > { %s71_s2 = sld [smem:[#allocation4 + %s70_s9]]  ;;  %s75_s10 = sadd.s32 4, %s228_s1 }
  0x27   : > { %s76_s11 = sld [smem:[#allocation4 + %s75_s10]]  ;;  %s80_s12 = sadd.s32 5, %s228_s1 }
  0x28   : > { %s81_s13 = sld [smem:[#allocation4 + %s80_s12]]  ;;  %s85_s14 = sadd.s32 6, %s228_s1 }
  0x29   : > { %s86_s15 = sld [smem:[#allocation4 + %s85_s14]]  ;;  %s58_s16 = scalar_lea.vmem [#allocation5], %s57_s30 }
  0x2a   : > { %v59_v0 = vld [vmem:[%s58_s16] sm:$0x1]  ;;  %s90_s17 = sadd.s32 7, %s228_s1  ;;  %s62_s18 = scalar_lea.vmem [#allocation5], %s61_s6 }
  0x2b   : > { %v63_v1 = vld [vmem:[%s62_s18] sm:$0x1]  ;;  %s91_s19 = sld [smem:[#allocation4 + %s90_s17]]  ;;  %s67_s20 = scalar_lea.vmem [#allocation5], %s66_s8 }
  0x2c   : > { %v64_v2 = vmax.f32 %v59_v0, %v63_v1  ;;  %v68_v3 = vld [vmem:[%s67_s20] sm:$0x1]  ;;  %s72_s21 = scalar_lea.vmem [#allocation5], %s71_s2  ;;  %s54_s29 = sadd.s32 1, %s385_s29  }
  0x2d   : > { %v73_v4 = vld [vmem:[%s72_s21] sm:$0x1]  ;;  %s77_s22 = scalar_lea.vmem [#allocation5], %s76_s11  ;;  %p51_p10 = scmp.ge.s32.totalorder %s54_s29, 8  }
  0x2e   : > { %v69_v5 = vmax.f32 %v64_v2, %v68_v3  ;;  %v78_v6 = vld [vmem:[%s77_s22] sm:$0x1]  ;;  %s82_s23 = scalar_lea.vmem [#allocation5], %s81_s13  ;;  %v392_v16 = vmov (%p51_p10), 0.0   ;;  %v112_v17 = vld [vmem:[#allocation8 + $0x70] sm:$0xff] (%p51_p10)  ;;  %vm393_vm0 = vmmov (%p51_p10), 0  }
  0x2f   : > { %v83_v8 = vld [vmem:[%s82_s23] sm:$0x1]  ;;  %s87_s0 = scalar_lea.vmem [#allocation5], %s86_s15  ;;  %248 = vmatprep.subr.mxu0 (%p51_p10), %v392_v16  ;;  %280 = vmatprep.mubr.msk.f32.mxu0 (%p51_p10), %vm393_vm0, %v392_v16  ;;  %v111_v18 = vld [vmem:[#allocation8 + $0x68] sm:$0xff] (%p51_p10)  ;;  %v110_v19 = vld [vmem:[#allocation8 + $0x60] sm:$0xff] (%p51_p10)  ;;  %s394_s28 = smov (%p51_p10), [#allocation10]  }
  0x30   : > { %v74_v7 = vmax.f32 %v69_v5, %v73_v4  ;;  %v88_v10 = vld [vmem:[%s87_s0] sm:$0x1]  ;;  %v108_v21 = vld [vmem:[#allocation8 + $0x50] sm:$0xff] (%p51_p10)  ;;  %v107_v22 = vld [vmem:[#allocation8 + $0x48] sm:$0xff] (%p51_p10)  ;;  %s204_s29 = sshll.u32 (%p51_p10), %s394_s28, 4  ;;  %s205_s29 = int_to_ptr.vmem [resolvable:$true] %s204_s29 }
  0x31   : > { %s92_s24 = scalar_lea.vmem [#allocation5], %s91_s19  ;;  %v113_v15 = vld [vmem:[#allocation8 + $0x78] sm:$0xff] (%p51_p10)  ;;  %v106_v23 = vld [vmem:[#allocation8 + $0x40] sm:$0xff] (%p51_p10)  ;;  %v104_v25 = vld [vmem:[#allocation8 + $0x30] sm:$0xff] (%p51_p10)  ;;  %s351_s1 = scalar_lea.vmem (%p51_p10), %s205_s29, 128 }
  0x32   : > { %v79_v9 = vmax.f32 %v74_v7, %v78_v6  ;;  %v93_v12 = vld [vmem:[%s92_s24] sm:$0x1]  ;;  %249 = vmatpush3.msra.mxu0 (%p51_p10), %v113_v15  ;;  %v103_v26 = vld [vmem:[#allocation8 + $0x28] sm:$0xff] (%p51_p10)  ;;  %v102_v27 = vld [vmem:[#allocation8 + $0x20] sm:$0xff] (%p51_p10)  ;;  %p352_p11 = scmp.ne.s32.totalorder (%p51_p10), %s205_s29, %s351_s1  ;;  %p356_p12 = scmp.lt.s32.totalorder (%p51_p10), %s205_s29, %s205_s29 }
  0x33   :  { %250 = vmatprep.subr.mxu0 (%p51_p10), %v392_v16  ;;  %v109_v20 = vld [vmem:[#allocation8 + $0x58] sm:$0xff] (%p51_p10)  ;;  %v100_v29 = vld [vmem:[#allocation8 + $0x10] sm:$0xff] (%p51_p10)  ;;  %v99_v30 = vld [vmem:[#allocation8 + $0x8] sm:$0xff] (%p51_p10)  ;;  %p357_p13 = scmp.lt.s32.totalorder (%p51_p10), %s351_s1, %s351_s1 }
  0x34   : > { %v84_v11 = vmax.f32 %v79_v9, %v83_v8  ;;  %251 = vmatpush3.msra.mxu0 (%p51_p10), %v112_v17  ;;  %v105_v24 = vld [vmem:[#allocation8 + $0x38] sm:$0xff] (%p51_p10)  ;;  %v98_v31 = vld [vmem:[#allocation8] sm:$0xff] (%p51_p10) }
  0x35   :  { %252 = vmatprep.subr.mxu0 (%p51_p10), %v392_v16  ;;  %v101_v28 = vld [vmem:[#allocation8 + $0x18] sm:$0xff] (%p51_p10)  ;;  %p358_p0 = por (%p51_p10), %p357_p13, %p356_p12 }
  0x36   : > { %v89_v13 = vmax.f32 %v84_v11, %v88_v10  ;;  %53 = sbr.rel (!%p51_p10) target bundleno = 34 (0x22), region = 56  ;;  %253 = vmatpush3.msra.mxu0 (%p51_p10), %v111_v18  ;;  %v229_v33 = vld [vmem:[%s448_s3] ss:$0 sm:$0xff] (%p51_p10) }
  0x37   :  { %254 = vmatprep.subr.mxu0 (%p51_p10), %v392_v16  ;;  %p359_p1 = pnand (%p51_p10), %p358_p0, %p352_p11 }
  0x38   : > { %v94_v14 = vmax.f32 %v89_v13, %v93_v12  ;;  %255 = vmatpush3.msra.mxu0 (%p51_p10), %v110_v19 }
  0x39   :  { %256 = vmatprep.subr.mxu0 (%p51_p10), %v392_v16 }
  0x3a   : > { %96 = vst [vmem:[%s95_s25] sm:$0x1] %v94_v14  ;;  %257 = vmatpush3.msra.mxu0 (%p51_p10), %v109_v20 }
  0x3b   :  { %258 = vmatprep.subr.mxu0 %v392_v16 }
  0x3c   :  { %259 = vmatpush3.msra.mxu0 %v108_v21 }
  0x3d   :  { %260 = vmatprep.subr.mxu0 %v392_v16 }
  0x3e   :  { %261 = vmatpush3.msra.mxu0 %v107_v22 }
  0x3f   :  { %262 = vmatprep.subr.mxu0 %v392_v16 }
  0x40   :  { %263 = vmatpush3.msra.mxu0 %v106_v23 }
  0x41   :  { %264 = vmatprep.subr.mxu0 %v392_v16  ;;  %v97_v32 = vld [vmem:[#allocation2] sm:$0xff] }
  0x42   :  { %265 = vmatpush3.msra.mxu0 %v105_v24 }
  0x43   :  { %266 = vmatprep.subr.mxu0 %v392_v16 }
  0x44   :  { %267 = vmatpush3.msra.mxu0 %v104_v25 }
  0x45   :  { %268 = vmatprep.subr.mxu0 %v392_v16 }
  0x46   :  { %269 = vmatpush3.msra.mxu0 %v103_v26 }
  0x47   :  { %270 = vmatprep.subr.mxu0 %v392_v16 }
  0x48   :  { %271 = vmatpush3.msra.mxu0 %v102_v27 }
  0x49   :  { %272 = vmatprep.subr.mxu0 %v392_v16 }
  0x4a   :  { %273 = vmatpush3.msra.mxu0 %v101_v28 }
  0x4b   :  { %274 = vmatprep.subr.mxu0 %v392_v16 }
  0x4c   :  { %275 = vmatpush3.msra.mxu0 %v100_v29 }
  0x4d   :  { %276 = vmatprep.subr.mxu0 %v392_v16 }
  0x4e   :  { %277 = vmatpush3.msra.mxu0 %v99_v30 }
  0x4f   :  { %278 = vmatprep.subr.mxu0 %v392_v16 }
  0x50   :  { %279 = vmatpush3.msra.mxu0 %v98_v31 }
  0x51   :  { %281 = vmatmul.mubr.f32.vlgmr.msra.gmra.mxu0 %v97_v32 }
 0x111   :  { %v187_v34 = vpop.f32.mrf.mxu0 }
 0x112   :  { %v188_v35 = vadd.f32 %v229_v33, %v187_v34 }
 0x113   :  { %v282_v36 = vpop.f32.mrf.mxu0 }
 0x114   :  { %v230_v37 = vmul.f32 -1.442695, %v188_v35 }
 0x116   :  { %299 = vpow2.f32 %v230_v37 }
 0x123   :  { %v300_v38 = vpop.eup %299 }
 0x124   :  { %v194_v39 = vadd.f32 1.0, %v300_v38 }
 0x126   :  { %301 = vrcp.f32 %v194_v39 }
 0x133   :  { %v302_v40 = vpop.eup %301 }
 0x134   :  { %197 = vst [vmem:[#allocation10] sm:$0xff] %v302_v40 }
 0x135   :  { %362 = shalt.err (!%p359_p1)
}
 0x136   :  { %207 = dma.vmem_to_hbm [thread:$0]  %s205_s29, 128, %s449_s4, [#allocation7]  }
 0x137   :  { %381 = dma.done.wait [#allocation7], 128  }
 0x138   :  { %382 = vsyncadd [#allocation7], 4294967168 }
 0x139   :  { %211 = vsyncpa [#allocation6], 1 }
 0x13a   :  { %212 = vsyncpa [#allocation9], 1 }
 0x13b   :  { %213 = vsyncpa [#allocation7], 1 }

</bundles_post_ra>
